<compile_context>
chip_gen: v6e
topology: v6e:2x2x1
jax: 0.10.0
libtpu: 0.0.40
codegen_flags: <defaults>
</compile_context>

<pallas_src>
import functools

import jax
import jax.numpy as jnp
from jax import lax
from jax.experimental import pallas as pl
from jax.experimental.pallas import tpu as pltpu


def _round_up(a, b):
    return ((a + b - 1) // b) * b


def _sepconv_kernel(*refs, taps, tile_l, halo_blk, has_halo, has_pw):
    """One (batch element, L-tile) per grid step.

    refs layout: x_ref, [halo_ref], dw_ref, [pw_ref], o_ref
      x_ref:    (1, S, C, tile_l)     main input tile (S = stride phases)
      halo_ref: (1, S, C, halo_blk)   first halo_blk cols of the next tile (optional)
      dw_ref:   (C, K)                depthwise taps
      pw_ref:   (Cout, C)             pointwise weights (optional)
      o_ref:    (1, Cout, tile_l)
    taps: static tuple of (phase, offset) per tap k, offsets <= halo_blk.
    """
    it = iter(refs)
    x_ref = next(it)
    halo_ref = next(it) if has_halo else None
    dw_ref = next(it)
    pw_ref = next(it) if has_pw else None
    o_ref = next(it)

    # Depthwise taps as (C, 1) f32 columns (lane-broadcast by the multiply).
    dw = dw_ref[...].astype(jnp.float32)                       # (C, K)
    dw_cols = [dw[:, k:k + 1] for k in range(len(taps))]

    def fir(read, width):
        # K-tap FIR on the VPU, f32 accumulation; init from tap 0 (no zeros+add).
        p0, o0 = taps[0]
        acc = read(p0, o0, width).astype(jnp.float32) * dw_cols[0]
        for k in range(1, len(taps)):
            pk, ok = taps[k]
            acc = acc + read(pk, ok, width).astype(jnp.float32) * dw_cols[k]
        return acc

    def emit(acc, col0, width):
        if pw_ref is not None:
            # Pointwise 1x1 conv: single 2-D channel-mixing matmul on the MXU,
            # f32 accumulation; bf16 inputs stay bf16 on the MXU.
            out = jnp.dot(pw_ref[...], acc.astype(pw_ref.dtype),
                          preferred_element_type=jnp.float32)  # (Cout, width)
        else:
            out = acc
        o_ref[0, :, col0:col0 + width] = out.astype(o_ref.dtype)

    w_main = tile_l - (halo_blk if has_halo else 0)

    if w_main > 0:
        # Main region: all tap offsets <= halo_blk, so every read is an in-bounds,
        # lane-aligned static slice of x_ref -- no stitched copy needed.
        emit(fir(lambda p, o, w: x_ref[0, p, :, pl.ds(o, w)], w_main), 0, w_main)

    if has_halo:
        # Tail region: small 2*halo_blk slab stitched from the x tail + halo block.
        slab = jnp.concatenate(
            [x_ref[0, :, :, pl.ds(w_main, halo_blk)], halo_ref[0]], axis=-1)
        emit(fir(lambda p, o, w: slab[p, :, o:o + w], halo_blk), w_main, halo_blk)


def separable_conv1d(x, dw_weight, pw_weight=None, *, stride=1, padding=0,
                     dilation=1, tile_l=2048, vmem_limit_bytes=None,
                     fold_batch=True, vmem_budget_bytes=32 * 1024 * 1024):
    """SeparableConv1d forward.

    x:         (N, C, L)
    dw_weight: (C, K)     depthwise nn.Conv1d(groups=C) weight (squeezed, bias=False)
    pw_weight: (Cout, C)  pointwise 1x1 nn.Conv1d weight; None => nn.Identity
    """
    N0, C0, L = x.shape
    K = dw_weight.shape[1]
    s = int(stride)
    d = int(dilation)
    p = int(padding)

    L_pad = L + 2 * p
    L_out = (L_pad - d * (K - 1) - 1) // s + 1
    if L_out <= 0:
        raise ValueError(
            f"non-positive output length: L={L} padding={padding} kernel={K} "
            f"dilation={dilation} stride={stride}")

    has_pw = pw_weight is not None
    Cout0 = pw_weight.shape[0] if has_pw else C0
    itemsize = jnp.dtype(x.dtype).itemsize

    # ---- batch -> channel fold for small channel counts (fills sublanes, shrinks
    # the grid).  Free reshape in NCL layout; depthwise weights are tiled and the
    # pointwise weight becomes block-diagonal so batches never mix.
    fold = 1
    if fold_batch:
        rows = 8 * max(1, 4 // itemsize)          # sublane rows per vreg for dtype
        if C0 < rows and N0 > 1:
            b_max = min(N0, max(1, rows // C0))
            for cand in range(b_max, 1, -1):
                if N0 % cand == 0:
                    fold = cand
                    break
    if fold > 1:
        x = x.reshape(N0 // fold, fold * C0, L)
        dw_weight = jnp.tile(dw_weight, (fold, 1))
        if has_pw:
            pw_weight = jnp.kron(jnp.eye(fold, dtype=pw_weight.dtype), pw_weight)
    N = N0 // fold
    C = fold * C0
    Cout = fold * Cout0

    # ---- polyphase decomposition: output j, tap k reads x_pad[j*s + k*d]
    #   = phases[(k*d) % s][j + (k*d)//s]  -> only static contiguous slices in-kernel.
    taps = tuple(((k * d) % s, (k * d) // s) for k in range(K))
    o_max = max(o for _, o in taps)
    has_halo = o_max > 0
    halo_blk = _round_up(o_max, 128) if has_halo else 0

    # ---- L tiling: lane-dense (multiple of 128 and of halo_blk), sized to a VMEM
    # budget (keeps v7x's 64 MiB happy; double-buffered x/out/weights + f32 temps).
    gran = max(128, halo_blk)

    def footprint(t):
        xb = 2 * s * C * (t + halo_blk) * itemsize          # main + halo, dbl-buffered
        ob = 2 * Cout * t * itemsize                        # output, dbl-buffered
        wb = 2 * C * K * itemsize + (2 * Cout * C * itemsize if has_pw else 0)
        tmp = 4 * C * t + 4 * Cout * t + 4 * s * C * 2 * max(halo_blk, 128)
        return xb + ob + wb + tmp

    tl_cap = max(gran, _round_up(L_out, gran))
    tl = min(_round_up(max(int(tile_l), 128), gran), tl_cap)
    while tl > gran and footprint(tl) > int(vmem_budget_bytes):
        tl -= gran
    num_l = pl.cdiv(L_out, tl)
    halo_ratio = (tl // halo_blk) if has_halo else 0

    # ---- single input pad covering conv padding, polyphase round-up and the halo
    # overrun of the last tile (one HBM pass instead of 2-3).
    # TODO(synk): CompilerParams(allow_input_fusion=...) could fold this pad/transpose
    # into the pallas_call operand; left off for robustness.
    Lph_need = num_l * tl + halo_blk
    right = max(0, Lph_need * s - (p + L))
    while (p + L + right) % s:
        right += 1
    x_pad = jnp.pad(x, ((0, 0), (0, 0), (p, right)))
    Ltot = p + L + right
    if s == 1:
        xp = x_pad[:, None, :, :]                            # (N, 1, C, Ltot)
    else:
        xp = x_pad.reshape(N, C, Ltot // s, s).transpose(0, 3, 1, 2)   # (N, s, C, Lph)

    dw = dw_weight.astype(x.dtype)

    ins = [xp]
    in_specs = [pl.BlockSpec((1, s, C, tl), lambda n, l: (n, 0, 0, l))]
    if has_halo:
        ins.append(xp)
        in_specs.append(pl.BlockSpec(
            (1, s, C, halo_blk),
            lambda n, l, _r=halo_ratio: (n, 0, 0, (l + 1) * _r)))
    ins.append(dw)
    # NOTE: weight specs are grid-invariant; pl.Buffered(1) would shave their second
    # VMEM buffer, but default double-buffering is already counted in the budget.
    in_specs.append(pl.BlockSpec((C, K), lambda n, l: (0, 0)))
    if has_pw:
        ins.append(pw_weight.astype(x.dtype))
        in_specs.append(pl.BlockSpec((Cout, C), lambda n, l: (0, 0)))

    if vmem_limit_bytes is None:
        est = footprint(tl)
        vmem_limit_bytes = min(64 << 20, max(32 << 20, int(est * 1.5) + (4 << 20)))

    flops = 2 * N * L_out * C * (K + (Cout if has_pw else 0))
    bytes_accessed = (N * s * C * Lph_need + N * Cout * L_out
                      + C * K + (Cout * C if has_pw else 0)) * itemsize

    kernel = functools.partial(_sepconv_kernel, taps=taps, tile_l=tl,
                               halo_blk=halo_blk, has_halo=has_halo, has_pw=has_pw)

    out = pl.pallas_call(
        kernel,
        out_shape=jax.ShapeDtypeStruct((N, Cout, L_out), x.dtype),
        grid_spec=pltpu.PrefetchScalarGridSpec(
            num_scalar_prefetch=0,
            grid=(N, num_l),                     # L tiles innermost: streaming DMA
            in_specs=in_specs,
            out_specs=pl.BlockSpec((1, Cout, tl), lambda n, l: (n, 0, l)),
        ),
        compiler_params=pltpu.CompilerParams(
            dimension_semantics=("parallel", "parallel"),   # megacore-friendly (v7x)
            vmem_limit_bytes=int(vmem_limit_bytes),
        ),
        cost_estimate=pl.CostEstimate(flops=int(flops), transcendentals=0,
                                      bytes_accessed=int(bytes_accessed)),
    )(*ins)

    if fold > 1:
        out = out.reshape(N0, Cout0, L_out)
    return out


def _reference(x, dw_weight, pw_weight, *, stride, padding, dilation):
    """Pure-JAX reference mirroring nn.Conv1d(groups=C) [+ nn.Conv1d(k=1)], bias=False."""
    C = x.shape[1]
    dw = dw_weight[:, None, :]                         # (C, 1, K)
    y = lax.conv_general_dilated(
        x, dw, window_strides=(stride,), padding=[(padding, padding)],
        rhs_dilation=(dilation,), dimension_numbers=("NCH", "OIH", "NCH"),
        feature_group_count=C)
    if pw_weight is not None:
        pw = pw_weight[:, :, None]                     # (Cout, C, 1)
        y = lax.conv_general_dilated(
            y, pw, window_strides=(1,), padding=[(0, 0)],
            dimension_numbers=("NCH", "OIH", "NCH"))
    return y


if __name__ == "__main__":
    key = jax.random.PRNGKey(0)

    def run_case(idx, name, *, N, Cin, Cout, K, L, stride=1, padding=0, dilation=1,
                 pointwise=True, dtype=jnp.float32, tile_l=2048, atol=1e-5, rtol=1e-5):
        kx, kd, kp = jax.random.split(jax.random.fold_in(key, idx), 3)
        x = jax.random.normal(kx, (N, Cin, L), dtype=jnp.float32).astype(dtype)
        dw = (jax.random.normal(kd, (Cin, K), dtype=jnp.float32) * 0.1).astype(dtype)
        pw = None
        if pointwise:
            pw = (jax.random.normal(kp, (Cout, Cin), dtype=jnp.float32) * 0.1).astype(dtype)

        y = separable_conv1d(x, dw, pw, stride=stride, padding=padding,
                             dilation=dilation, tile_l=tile_l)
        y = jax.block_until_ready(y)

        y_ref = _reference(x.astype(jnp.float32), dw.astype(jnp.float32),
                           None if pw is None else pw.astype(jnp.float32),
                           stride=stride, padding=padding, dilation=dilation)
        assert y.shape == y_ref.shape, (name, y.shape, y_ref.shape)
        ok = jnp.allclose(jnp.asarray(y, jnp.float32), y_ref, atol=atol, rtol=rtol)
        assert bool(ok), f"mismatch vs reference: {name}"

    # SeparableConv1d(in=4, out=8, k=3, padding=1) -- the module's typical config
    # (exercises the batch->channel fold).
    run_case(0, "base",           N=2, Cin=4, Cout=8,  K=3, L=16,  padding=1)
    # dilation / stride variants of the nn.Conv1d arguments.
    run_case(1, "dilated",        N=2, Cin=4, Cout=8,  K=3, L=16,  padding=2, dilation=2)
    run_case(2, "strided",        N=2, Cin=4, Cout=6,  K=3, L=17,  padding=1, stride=2)
    # multi-tile L with a ragged (masked) last output tile; no batch fold (Cin=8).
    run_case(3, "multi_tile",     N=2, Cin=8, Cout=16, K=3, L=300, padding=1, tile_l=128)
    # main-region + tail-slab split path (tl > halo_blk), K=5.
    run_case(4, "main_plus_tail", N=1, Cin=8, Cout=8,  K=5, L=1000, padding=2, tile_l=256)
    # K=1: no halo block / no stitch path.
    run_case(5, "k1_no_halo",     N=2, Cin=8, Cout=16, K=1, L=64)
    # pointwise=False -> nn.Identity second stage.
    run_case(6, "no_pointwise",   N=2, Cin=4, Cout=4,  K=3, L=16,  padding=1, pointwise=False)
    # stride 2 with multiple L tiles (polyphase + main/tail split).
    run_case(7, "strided_long",   N=2, Cin=4, Cout=8,  K=3, L=700, padding=1, stride=2,
             tile_l=256)
    # bf16 datapath (f32 FIR accumulation, bf16 MXU inputs, f32 matmul accumulation).
    run_case(8, "bf16",           N=2, Cin=4, Cout=8,  K=3, L=16,  padding=1,
             dtype=jnp.bfloat16, atol=3e-2, rtol=3e-2)

    print("KERNEL_OK")
</pallas_src>

<mosaic_0001>
module attributes {stable_mosaic.version = 11 : i64} {
  func.func @_sepconv_kernel(%arg0: i32, %arg1: i32, %arg2: memref<1x1x8x128xf32, #tpu.memory_space<vmem>>, %arg3: memref<1x1x8x128xf32, #tpu.memory_space<vmem>>, %arg4: memref<8x3xf32, #tpu.memory_space<vmem>>, %arg5: memref<16x8xf32, #tpu.memory_space<vmem>>, %arg6: memref<1x16x128xf32, #tpu.memory_space<vmem>>) attributes {dimension_semantics = [#tpu.dimension_semantics<parallel>, #tpu.dimension_semantics<parallel>], iteration_bounds = array<i64: 1, 1>, scalar_prefetch = 0 : i64, scratch_operands = 0 : i64, tpu.core_type = #tpu.core_type<tc>, window_params = [{transform_indices = @transform_0, window_bounds = array<i64: 1, 1, 8, 128>}, {transform_indices = @transform_1, window_bounds = array<i64: 1, 1, 8, 128>}, {pipeline_mode = #tpu.pipeline_mode<synchronous>, transform_indices = @transform_2, window_bounds = array<i64: 8, 3>}, {pipeline_mode = #tpu.pipeline_mode<synchronous>, transform_indices = @transform_3, window_bounds = array<i64: 16, 8>}, {transform_indices = @transform_4, window_bounds = array<i64: 1, 16, 128>}]} {
    %c0 = arith.constant 0 : index
    %c0_0 = arith.constant 0 : index
    %0 = vector.load %arg4[%c0, %c0_0] : memref<8x3xf32, #tpu.memory_space<vmem>>, vector<8x3xf32>
    %1 = vector.extract_strided_slice %0 {offsets = [0, 0], sizes = [8, 1], strides = [1, 1]} : vector<8x3xf32> to vector<8x1xf32>
    %2 = vector.extract_strided_slice %0 {offsets = [0, 1], sizes = [8, 1], strides = [1, 1]} : vector<8x3xf32> to vector<8x1xf32>
    %3 = vector.extract_strided_slice %0 {offsets = [0, 2], sizes = [8, 1], strides = [1, 1]} : vector<8x3xf32> to vector<8x1xf32>
    %c0_1 = arith.constant 0 : index
    %c0_2 = arith.constant 0 : index
    %c0_3 = arith.constant 0 : index
    %c0_4 = arith.constant 0 : index
    %4 = vector.load %arg2[%c0_1, %c0_2, %c0_3, %c0_4] : memref<1x1x8x128xf32, #tpu.memory_space<vmem>>, vector<1x1x8x128xf32>
    %5 = vector.shape_cast %4 : vector<1x1x8x128xf32> to vector<1x8x128xf32>
    %c0_5 = arith.constant 0 : index
    %c0_6 = arith.constant 0 : index
    %c0_7 = arith.constant 0 : index
    %c0_8 = arith.constant 0 : index
    %6 = vector.load %arg3[%c0_5, %c0_6, %c0_7, %c0_8] : memref<1x1x8x128xf32, #tpu.memory_space<vmem>>, vector<1x1x8x128xf32>
    %7 = vector.shape_cast %6 : vector<1x1x8x128xf32> to vector<1x8x128xf32>
    %8 = tpu.concatenate %5, %7 in 2 : vector<1x8x128xf32>, vector<1x8x128xf32> -> vector<1x8x256xf32>
    %9 = vector.extract_strided_slice %8 {offsets = [0, 0, 0], sizes = [1, 8, 128], strides = [1, 1, 1]} : vector<1x8x256xf32> to vector<1x8x128xf32>
    %10 = vector.shape_cast %9 : vector<1x8x128xf32> to vector<8x128xf32>
    %11 = vector.broadcast %1 : vector<8x1xf32> to vector<8x128xf32>
    %12 = arith.mulf %10, %11 : vector<8x128xf32>
    %13 = vector.extract_strided_slice %8 {offsets = [0, 0, 1], sizes = [1, 8, 128], strides = [1, 1, 1]} : vector<1x8x256xf32> to vector<1x8x128xf32>
    %14 = vector.shape_cast %13 : vector<1x8x128xf32> to vector<8x128xf32>
    %15 = vector.broadcast %2 : vector<8x1xf32> to vector<8x128xf32>
    %16 = arith.mulf %14, %15 : vector<8x128xf32>
    %17 = arith.addf %12, %16 : vector<8x128xf32>
    %18 = vector.extract_strided_slice %8 {offsets = [0, 0, 2], sizes = [1, 8, 128], strides = [1, 1, 1]} : vector<1x8x256xf32> to vector<1x8x128xf32>
    %19 = vector.shape_cast %18 : vector<1x8x128xf32> to vector<8x128xf32>
    %20 = vector.broadcast %3 : vector<8x1xf32> to vector<8x128xf32>
    %21 = arith.mulf %19, %20 : vector<8x128xf32>
    %22 = arith.addf %17, %21 : vector<8x128xf32>
    %c0_9 = arith.constant 0 : index
    %c0_10 = arith.constant 0 : index
    %23 = vector.load %arg5[%c0_9, %c0_10] : memref<16x8xf32, #tpu.memory_space<vmem>>, vector<16x8xf32>
    %cst = arith.constant dense<0.000000e+00> : vector<16x128xf32>
    %24 = tpu.matmul %23, %22, %cst {dimension_numbers = #tpu.dot_dimension_numbers<[1], [0], [0], [1], [0, 0, 1, 1], [], []>} : vector<16x8xf32>, vector<8x128xf32>, vector<16x128xf32> -> vector<16x128xf32>
    %c0_11 = arith.constant 0 : index
    %c0_12 = arith.constant 0 : index
    %c0_13 = arith.constant 0 : index
    %25 = vector.load %arg6[%c0_11, %c0_12, %c0_13] : memref<1x16x128xf32, #tpu.memory_space<vmem>>, vector<1x16x128xf32>
    %26 = vector.shape_cast %25 : vector<1x16x128xf32> to vector<16x128xf32>
    %27 = vector.shape_cast %24 : vector<16x128xf32> to vector<1x16x128xf32>
    tpu.vector_store %arg6[%c0_11, %c0_12, %c0_13], %27 {strides = array<i32>} : memref<1x16x128xf32, #tpu.memory_space<vmem>>, vector<1x16x128xf32>,
    return
  }
  func.func @transform_0(%arg0: i32, %arg1: i32) -> (i32, i32, i32, i32) {
    %c0_i32 = arith.constant 0 : i32
    %c0_i32_0 = arith.constant 0 : i32
    %c0_i32_1 = arith.constant 0 : i32
    return %arg0, %c0_i32, %c0_i32_0, %arg1 : i32, i32, i32, i32
  }
  func.func @transform_1(%arg0: i32, %arg1: i32) -> (i32, i32, i32, i32) {
    %c1_i32 = arith.constant 1 : i32
    %0 = arith.addi %arg1, %c1_i32 : i32
    %c1_i32_0 = arith.constant 1 : i32
    %1 = arith.muli %0, %c1_i32_0 : i32
    %c0_i32 = arith.constant 0 : i32
    %c0_i32_1 = arith.constant 0 : i32
    %c0_i32_2 = arith.constant 0 : i32
    return %arg0, %c0_i32, %c0_i32_1, %1 : i32, i32, i32, i32
  }
  func.func @transform_2(%arg0: i32, %arg1: i32) -> (i32, i32) {
    %c0_i32 = arith.constant 0 : i32
    %c0_i32_0 = arith.constant 0 : i32
    %c0_i32_1 = arith.constant 0 : i32
    return %c0_i32, %c0_i32_0 : i32, i32
  }
  func.func @transform_3(%arg0: i32, %arg1: i32) -> (i32, i32) {
    %c0_i32 = arith.constant 0 : i32
    %c0_i32_0 = arith.constant 0 : i32
    %c0_i32_1 = arith.constant 0 : i32
    return %c0_i32, %c0_i32_0 : i32, i32
  }
  func.func @transform_4(%arg0: i32, %arg1: i32) -> (i32, i32, i32) {
    %c0_i32 = arith.constant 0 : i32
    %c0_i32_0 = arith.constant 0 : i32
    return %arg0, %c0_i32, %arg1 : i32, i32, i32
  }
}

</mosaic_0001>

<bundles_post_ra>
// kernel: tpu_custom_call.1
= control target key start
LH: loop header
LB: loop body
LE: loop exit
PB: predicated region body
PF: predicated region fallthrough
CT: control target
= control target key end

     0   :  { %v228_v1 = vmov 1   ;;  %v229_v2 = vmov 0   ;;  %s281_s0 = inlined_call_operand.vmem [shape: f32[1,1,8,256], index: 0, kind: input, shape index: {}]   ;;  %s282_s1 = inlined_call_operand.vmem [shape: f32[1,1,8,256], index: 1, kind: input, shape index: {}]   ;;  %s283_s2 = inlined_call_operand.vmem [shape: f32[8,3], index: 2, kind: input, shape index: {}]   ;;  %s284_s3 = inlined_call_operand.vmem [shape: f32[16,8], index: 3, kind: input, shape index: {}]   ;;  %s285_s4 = inlined_call_operand.hbm [shape: f32[1,16,16], index: 4, kind: output, shape index: {}]  }
   0x1   :  { %v35_v0 = vld [vmem:[%s283_s2] sm:$0xff]  ;;  %203 = vset.pattern.permute.xlu0 %v228_v1  ;;  %205 = vset.pattern.permute.xlu1 %v229_v2 }
   0x2   :  { %9 = vsyncpa [#allocation3], 0  ;;  %45 = vperm.xlu0 %203, %v35_v0   ;;  %40 = vperm.xlu1 %205, %v35_v0   ;;  %v230_v3 = vmov 2   ;;  %v36_v4 = vld [vmem:[%s281_s0] sm:$0xff]  ;;  %vm78_vm0 = vcmask 64512   ;;  %v184_v8 = vld [vmem:[%s282_s1 + $0x8] sm:$0xff] }
   0x3   :  { %v76_v7 = vld [vmem:[%s284_s3] sm:$0xff]  ;;  %s231_s22 = smov 127   ;;  %s232_s0 = smov 126   ;;  %vm56_vm1 = vcmask 1039360   ;;  %vm72_vm2 = vcmask 1031168   ;;  %v77_v23 = vld [vmem:[%s284_s3 + $0x8] sm:$0xff] }
   0x4   :  { %192 = vmatprep.mubr.msk.f32.mxu0 %vm78_vm0, %v76_v7  ;;  %s233_s24 = smov [#allocation2]  }
   0x5   :  { %s167_s25 = sshll.u32 %s233_s24, 4  ;;  %s168_s25 = int_to_ptr.vmem [resolvable:$true] %s167_s25 }
   0x6   :  { %204 = vset.pattern.permute.xlu0 %v230_v3  ;;  %s206_s26 = scalar_lea.vmem %s168_s25, 256  ;;  %p211_p1 = scmp.lt.s32.totalorder %s168_s25, %s168_s25 }
   0x7   :  { %61 = vperm.xlu0 %204, %v35_v0   ;;  %p207_p0 = scmp.ne.s32.totalorder %s168_s25, %s206_s26  ;;  %p212_p2 = scmp.lt.s32.totalorder %s206_s26, %s206_s26 }
   0x9   :  { %p213_p3 = por %p212_p2, %p211_p1 }
   0xb   :  { %p214_p4 = pnand %p213_p3, %p207_p0 }
  0x7d   :  { %v46_v5 = vpop.permute.xlu0 %45  ;;  %v41_v13 = vpop.permute.xlu1 %40 }
  0x7e   :  { %v48_v6 = vmul.f32 %v46_v5, %v36_v4  ;;  %v49_v9 = vmul.f32 %v184_v8, %v46_v5  ;;  %v43_v17 = vmul.f32 %v41_v13, %v36_v4 }
  0x80   :  { %52 = vrot.lane.b32.xlu1 %v48_v6, %s231_s22 }
  0x82   :  { %v62_v10 = vpop.permute.xlu0 %61 }
  0x83   :  { %v64_v11 = vmul.f32 %v62_v10, %v36_v4  ;;  %v65_v12 = vmul.f32 %v184_v8, %v62_v10 }
  0x84   :  { %54 = vrot.lane.b32.xlu1 %v49_v9, %s231_s22 }
  0x85   :  { %68 = vrot.lane.b32.xlu0 %v64_v11, %s232_s0 }
  0x88   :  { %70 = vrot.lane.b32.xlu1 %v65_v12, %s232_s0 }
  0xf2   :  { %v53_v14 = vpop.permute.xlu1 %52 }
  0xf6   :  { %v55_v15 = vpop.permute.xlu1 %54 }
  0xf7   :  { %v57_v16 = vsel %vm56_vm1, %v53_v14, %v55_v15  ;;  %v69_v18 = vpop.permute.xlu0 %68 }
  0xf8   :  { %v59_v19 = vadd.f32 %v57_v16, %v43_v17 }
  0xfa   :  { %v71_v20 = vpop.permute.xlu1 %70 }
  0xfb   :  { %v73_v21 = vsel %vm72_vm2, %v69_v18, %v71_v20 }
  0xfc   :  { %v75_v22 = vadd.f32 %v73_v21, %v59_v19 }
  0xfe   :  { %190 = vmatprep.subr.mxu0 %v75_v22 }
  0xff   :  { %191 = vmatpush3.msra.mxu0 %v75_v22 }
 0x100   :  { %193 = vmatmul.mubr.msk.f32.vlgmr.msra.gmra.mxu0 %vm78_vm0, %v77_v23 }
 0x1c0   :  { %v194_v24 = vpop.f32.mrf.mxu0 }
 0x1c1   :  { %161 = vst [vmem:[#allocation2 + $0x8] sm:$0xff] %v194_v24 }
 0x1c2   :  { %v151_v25 = vpop.f32.mrf.mxu0 }
 0x1c3   :  { %160 = vst [vmem:[#allocation2] sm:$0xff] %v151_v25 }
 0x1c4   :  { %217 = shalt.err (!%p214_p4)
}
 0x1c5   :  { %s234_s27 = smov 128   ;;  %s235_s3 = smov 8  }
 0x1c6   :  { %173 = dma.vmem_to_hbm [thread:$0]  %s168_s25, 256, %s285_s4, [#allocation3], %s234_s27, %s234_s27, %s235_s3  }
 0x1c7   :  { %226 = dma.done.wait [#allocation3], 256  }
 0x1c8   :  { %227 = vsyncadd [#allocation3], 4294967040 }
 0x1c9   :  { %177 = vsyncpa [#allocation3], 1 }

</bundles_post_ra>
